<compile_context>
chip_gen: v7x
topology: tpu7x:2x2x1
jax: 0.10.0
libtpu: 0.0.40
codegen_flags: <defaults>
</compile_context>

<pallas_src>
import functools

import jax
import jax.numpy as jnp
from jax.experimental import pallas as pl
from jax.experimental.pallas import tpu as pltpu


def _round_up(x, m):
    return (x + m - 1) // m * m


def _pow2_le(n):
    return 1 << (max(1, int(n)).bit_length() - 1)


def _vmem_capacity_bytes():
    try:
        return int(pltpu.get_tpu_info().vmem_capacity_bytes)
    except Exception:
        return 64 << 20  # conservative (v7x-sized) default


def _fold_lanes_128(x):
    """(R, 128 * 2^m) -> (R, 128) by pairwise-halving adds.

    Slices are at multiples of 128 lanes, so this is VALU-only (no XLU reduce,
    no relayout); trace size is log2(chunks) statements.
    """
    w = x.shape[1]
    while w > 128:
        h = w // 2
        x = x[:, :h] + x[:, h:w]
        w = h
    return x


def _loss_kernel(pred_ref, targ_ref, out_ref,
                 bce_acc, inter_acc, pts_acc, *,
                 smooth, nc_total, hw_total, tile_nc, tile_hw,
                 mask_rows, mask_lanes, approx_sigmoid):
    k = pl.program_id(1)  # HW (reduction) axis, innermost

    @pl.when(k == 0)
    def _init():
        bce_acc[...] = jnp.zeros_like(bce_acc)
        inter_acc[...] = jnp.zeros_like(inter_acc)
        pts_acc[...] = jnp.zeros_like(pts_acc)

    # Load in native dtype, upcast in-register (accumulators stay f32).
    x = pred_ref[...].astype(jnp.float32)   # (tile_nc, tile_hw) logits
    t = targ_ref[...].astype(jnp.float32)   # (tile_nc, tile_hw) targets in [0,1]

    # Validity mask for ragged last row-block / lane-tile. `mask_*` are static
    # Python bools, so this whole section compiles away when tiles divide evenly.
    valid = None
    if mask_lanes:
        lane = jax.lax.broadcasted_iota(jnp.int32, x.shape, 1) + k * tile_hw
        valid = lane < hw_total
    if mask_rows:
        row = (jax.lax.broadcasted_iota(jnp.int32, x.shape, 0)
               + pl.program_id(0) * tile_nc)
        rmask = row < nc_total
        valid = rmask if valid is None else jnp.logical_and(valid, rmask)
    if valid is not None:
        t = jnp.where(valid, t, 0.0)

    # Shared exp(-|x|) between the stable BCE softplus term and the sigmoid.
    e = jnp.exp(-jnp.abs(x))
    bce_elem = jnp.maximum(x, 0.0) - x * t + jnp.log1p(e)
    if approx_sigmoid:
        inv = pl.reciprocal(1.0 + e, approx=True)
    else:
        inv = 1.0 / (1.0 + e)
    p = jnp.where(x >= 0.0, inv, 1.0 - inv)   # sigmoid(x); e/(1+e) == 1 - 1/(1+e)
    if valid is not None:
        bce_elem = jnp.where(valid, bce_elem, 0.0)
        p = jnp.where(valid, p, 0.0)

    # Deferred reduction: lane-dense (tile_nc, 128) accumulators, VALU adds only.
    bce_acc[...] += _fold_lanes_128(bce_elem)
    inter_acc[...] += _fold_lanes_128(p * t)
    pts_acc[...] += _fold_lanes_128(p + t)

    # Finalize + single lane-dense output write, only on the last HW step.
    @pl.when(k == pl.num_programs(1) - 1)
    def _finalize():
        bce_sum = jnp.sum(bce_acc[...])
        inter = jnp.sum(inter_acc[...], axis=1, keepdims=True)   # (tile_nc, 1)
        pts = jnp.sum(pts_acc[...], axis=1, keepdims=True)
        # Fully-masked (padded) rows have all-zero stats -> 1 - smooth/smooth = 0,
        # so they contribute nothing; the wrapper divides by the true row count.
        dice_rows = 1.0 - (2.0 * inter + smooth) / (pts + smooth)
        dice_sum = jnp.sum(dice_rows)

        lane_o = jax.lax.broadcasted_iota(jnp.int32, out_ref.shape, 2)
        out_ref[...] = jnp.where(lane_o == 0, bce_sum,
                                 jnp.where(lane_o == 1, dice_sum, 0.0))


def calculate_loss_pallas(pred, target, *, bce_weight=0.5, smooth=1e-5,
                          max_block_rows=512, max_lane_chunks=512,
                          approx_sigmoid=False):
    """pred, target: (N, C, H, W) arrays. Returns (loss, bce, dice) f32 scalars."""
    N, C, H, W = pred.shape
    NC, HW = N * C, H * W

    # Flattened (N*C, H*W) views; no padding, no dtype upcast in HBM.
    p2 = pred.reshape(NC, HW)
    t2 = target.reshape(NC, HW)
    pi, ti = p2.dtype.itemsize, t2.dtype.itemsize

    # --- Row (NC) blocking -------------------------------------------------
    if NC <= max_block_rows:
        tile_nc = NC                              # full dim: exempt from 8-rule
    else:
        tile_nc = max(8, (max_block_rows // 8) * 8)
    nc_blocks = pl.cdiv(NC, tile_nc)

    # --- Lane (HW) tiling ---------------------------------------------------
    # Per-generation input-VMEM budget (2 inputs x 2 pipeline buffers).
    vmem_cap = _vmem_capacity_bytes()
    input_budget = (32 << 20) if vmem_cap >= (96 << 20) else (16 << 20)
    bytes_per_chunk = tile_nc * 128 * 2 * (pi + ti)      # one 128-lane chunk, dbl-buf
    c_budget = max(1, input_budget // bytes_per_chunk)
    hw_chunks = pl.cdiv(HW, 128)
    chunks = max(1, min(_pow2_le(c_budget),
                        pl.next_power_of_2(hw_chunks),
                        _pow2_le(max_lane_chunks)))       # power of two (tree fold)
    tile_hw = 128 * chunks
    hw_blocks = pl.cdiv(HW, tile_hw)

    mask_rows = (NC % tile_nc) != 0
    mask_lanes = (HW % tile_hw) != 0

    # --- VMEM budget (inputs + accumulators + output + headroom) ------------
    in_vmem = 2 * tile_nc * tile_hw * (pi + ti)
    acc_vmem = 3 * _round_up(tile_nc, 8) * 128 * 4
    out_vmem = 2 * 8 * 128 * 4
    vmem_need = in_vmem + acc_vmem + out_vmem + (4 << 20)
    vmem_cap_lim = min(100 << 20, max(16 << 20, vmem_cap - (4 << 20)))
    vmem_limit = int(min(max(vmem_need, 16 << 20), vmem_cap_lim))

    kernel = functools.partial(
        _loss_kernel,
        smooth=float(smooth),
        nc_total=NC,
        hw_total=HW,
        tile_nc=tile_nc,
        tile_hw=tile_hw,
        mask_rows=mask_rows,
        mask_lanes=mask_lanes,
        approx_sigmoid=bool(approx_sigmoid),
    )

    out = pl.pallas_call(
        kernel,
        out_shape=jax.ShapeDtypeStruct((nc_blocks, 1, 128), jnp.float32),
        grid_spec=pltpu.PrefetchScalarGridSpec(
            num_scalar_prefetch=0,
            grid=(nc_blocks, hw_blocks),
            in_specs=[
                pl.BlockSpec((tile_nc, tile_hw), lambda i, k: (i, k)),
                pl.BlockSpec((tile_nc, tile_hw), lambda i, k: (i, k)),
            ],
            out_specs=pl.BlockSpec((1, 1, 128), lambda i, k: (i, 0, 0)),
            scratch_shapes=[pltpu.VMEM((tile_nc, 128), jnp.float32)] * 3,
        ),
        compiler_params=pltpu.CompilerParams(
            dimension_semantics=("parallel", "arbitrary"),
            vmem_limit_bytes=vmem_limit,
        ),
    )(p2, t2)

    # Tiny final combine of per-row-block partials (scalar work, done by XLA).
    bce = jnp.sum(out[:, 0, 0]) / float(N * C * H * W)
    dice = jnp.sum(out[:, 0, 1]) / float(NC)
    loss = bce * bce_weight + dice * (1.0 - bce_weight)
    return loss, bce, dice


def _reference(pred, target, bce_weight=0.5, smooth=1e-5):
    x = pred.astype(jnp.float32)
    t = target.astype(jnp.float32)
    bce = jnp.mean(jnp.maximum(x, 0.0) - x * t + jnp.log1p(jnp.exp(-jnp.abs(x))))
    p = jax.nn.sigmoid(x)
    inter = jnp.sum(p * t, axis=(2, 3))
    dice = jnp.mean(1.0 - (2.0 * inter + smooth)
                    / (jnp.sum(p, axis=(2, 3)) + jnp.sum(t, axis=(2, 3)) + smooth))
    return bce * bce_weight + dice * (1.0 - bce_weight)


# TODO(synk): the PyTorch module's `metric` / `metrics` dict side effects and
# detach/clone bookkeeping are host-side and have no kernel equivalent; the
# kernel returns (loss, bce, dice) so the caller can populate them.

if __name__ == "__main__":
    key = jax.random.PRNGKey(0)
    k1, k2, k3, k4 = jax.random.split(key, 4)

    # Primary config implied by the module: batch=2, n_class=4, 16x16 spatial.
    pred = jax.random.normal(k1, (2, 4, 16, 16), dtype=jnp.float32)
    target = (jax.random.uniform(k2, (2, 4, 16, 16)) > 0.5).astype(jnp.float32)
    loss, bce, dice = calculate_loss_pallas(pred, target, bce_weight=0.5)
    jax.block_until_ready(loss)
    ref = _reference(pred, target, bce_weight=0.5)
    assert jnp.allclose(loss, ref, rtol=1e-4, atol=1e-5), (loss, ref)

    # Ragged / multi-block config: exercises row+lane masking, NC row blocking
    # (parallel axis), multi-step HW accumulation, and bf16 inputs.
    pred2 = jax.random.normal(k3, (4, 5, 12, 12), dtype=jnp.bfloat16)
    target2 = (jax.random.uniform(k4, (4, 5, 12, 12)) > 0.5).astype(jnp.bfloat16)
    loss2, _, _ = calculate_loss_pallas(pred2, target2, bce_weight=0.3,
                                        max_block_rows=8, max_lane_chunks=1)
    jax.block_until_ready(loss2)
    ref2 = _reference(pred2, target2, bce_weight=0.3)
    assert jnp.allclose(loss2, ref2, rtol=2e-3, atol=2e-3), (loss2, ref2)

    print("KERNEL_OK")
</pallas_src>

<mosaic_0001>
module attributes {stable_mosaic.version = 11 : i64} {
  func.func @_loss_kernel(%arg0: i32, %arg1: i32, %arg2: memref<8x256xf32, #tpu.memory_space<vmem>>, %arg3: memref<8x256xf32, #tpu.memory_space<vmem>>, %arg4: memref<1x1x128xf32, #tpu.memory_space<vmem>>, %arg5: memref<8x128xf32, #tpu.memory_space<vmem>>, %arg6: memref<8x128xf32, #tpu.memory_space<vmem>>, %arg7: memref<8x128xf32, #tpu.memory_space<vmem>>) attributes {dimension_semantics = [#tpu.dimension_semantics<parallel>, #tpu.dimension_semantics<arbitrary>], iteration_bounds = array<i64: 1, 1>, scalar_prefetch = 0 : i64, scratch_operands = 3 : i64, tpu.core_type = #tpu.core_type<tc>, window_params = [{transform_indices = @transform_0, window_bounds = array<i64: 8, 256>}, {transform_indices = @transform_1, window_bounds = array<i64: 8, 256>}, {transform_indices = @transform_2, window_bounds = array<i64: 1, 1, 128>}]} {
    %c0_i32 = arith.constant 0 : i32
    %0 = arith.cmpi eq, %arg1, %c0_i32 : i32
    %1 = arith.extui %0 : i1 to i32
    %c0_i32_0 = arith.constant 0 : i32
    %2 = arith.cmpi ne, %1, %c0_i32_0 : i32
    scf.if %2 {
      %cst_23 = arith.constant 0.000000e+00 : f32
      %47 = vector.broadcast %cst_23 : f32 to vector<8x128xf32>
      %c0_24 = arith.constant 0 : index
      %c0_25 = arith.constant 0 : index
      %48 = vector.load %arg5[%c0_24, %c0_25] : memref<8x128xf32, #tpu.memory_space<vmem>>, vector<8x128xf32>
      tpu.vector_store %arg5[%c0_24, %c0_25], %47 {strides = array<i32>} : memref<8x128xf32, #tpu.memory_space<vmem>>, vector<8x128xf32>,
      %cst_26 = arith.constant 0.000000e+00 : f32
      %49 = vector.broadcast %cst_26 : f32 to vector<8x128xf32>
      %c0_27 = arith.constant 0 : index
      %c0_28 = arith.constant 0 : index
      %50 = vector.load %arg6[%c0_27, %c0_28] : memref<8x128xf32, #tpu.memory_space<vmem>>, vector<8x128xf32>
      tpu.vector_store %arg6[%c0_27, %c0_28], %49 {strides = array<i32>} : memref<8x128xf32, #tpu.memory_space<vmem>>, vector<8x128xf32>,
      %cst_29 = arith.constant 0.000000e+00 : f32
      %51 = vector.broadcast %cst_29 : f32 to vector<8x128xf32>
      %c0_30 = arith.constant 0 : index
      %c0_31 = arith.constant 0 : index
      %52 = vector.load %arg7[%c0_30, %c0_31] : memref<8x128xf32, #tpu.memory_space<vmem>>, vector<8x128xf32>
      tpu.vector_store %arg7[%c0_30, %c0_31], %51 {strides = array<i32>} : memref<8x128xf32, #tpu.memory_space<vmem>>, vector<8x128xf32>,
    } else {
    }
    %c0 = arith.constant 0 : index
    %c0_1 = arith.constant 0 : index
    %3 = vector.load %arg2[%c0, %c0_1] : memref<8x256xf32, #tpu.memory_space<vmem>>, vector<8x256xf32>
    %c0_2 = arith.constant 0 : index
    %c0_3 = arith.constant 0 : index
    %4 = vector.load %arg3[%c0_2, %c0_3] : memref<8x256xf32, #tpu.memory_space<vmem>>, vector<8x256xf32>
    %5 = math.absf %3 : vector<8x256xf32>
    %cst = arith.constant 0.000000e+00 : f32
    %6 = vector.broadcast %cst : f32 to vector<8x256xf32>
    %7 = arith.subf %6, %5 : vector<8x256xf32>
    %8 = math.exp %7 : vector<8x256xf32>
    %cst_4 = arith.constant 0.000000e+00 : f32
    %9 = vector.broadcast %cst_4 : f32 to vector<8x256xf32>
    %10 = arith.maximumf %3, %9 : vector<8x256xf32>
    %11 = arith.mulf %3, %4 : vector<8x256xf32>
    %12 = arith.subf %10, %11 : vector<8x256xf32>
    %13 = math.log1p %8 : vector<8x256xf32>
    %14 = arith.addf %12, %13 : vector<8x256xf32>
    %cst_5 = arith.constant 1.000000e+00 : f32
    %15 = vector.broadcast %cst_5 : f32 to vector<8x256xf32>
    %16 = arith.addf %15, %8 : vector<8x256xf32>
    %cst_6 = arith.constant 1.000000e+00 : f32
    %17 = vector.broadcast %cst_6 : f32 to vector<8x256xf32>
    %18 = arith.divf %17, %16 : vector<8x256xf32>
    %cst_7 = arith.constant 0.000000e+00 : f32
    %19 = vector.broadcast %cst_7 : f32 to vector<8x256xf32>
    %20 = arith.cmpf oge, %3, %19 : vector<8x256xf32>
    %cst_8 = arith.constant 1.000000e+00 : f32
    %21 = vector.broadcast %cst_8 : f32 to vector<8x256xf32>
    %22 = arith.subf %21, %18 : vector<8x256xf32>
    %23 = arith.select %20, %18, %22 : vector<8x256xi1>, vector<8x256xf32>
    %c0_9 = arith.constant 0 : index
    %c0_10 = arith.constant 0 : index
    %24 = vector.load %arg5[%c0_9, %c0_10] : memref<8x128xf32, #tpu.memory_space<vmem>>, vector<8x128xf32>
    %25 = vector.extract_strided_slice %14 {offsets = [0, 0], sizes = [8, 128], strides = [1, 1]} : vector<8x256xf32> to vector<8x128xf32>
    %26 = vector.extract_strided_slice %14 {offsets = [0, 128], sizes = [8, 128], strides = [1, 1]} : vector<8x256xf32> to vector<8x128xf32>
    %27 = arith.addf %25, %26 : vector<8x128xf32>
    %28 = arith.addf %24, %27 : vector<8x128xf32>
    %c0_11 = arith.constant 0 : index
    %c0_12 = arith.constant 0 : index
    %29 = vector.load %arg5[%c0_11, %c0_12] : memref<8x128xf32, #tpu.memory_space<vmem>>, vector<8x128xf32>
    tpu.vector_store %arg5[%c0_11, %c0_12], %28 {strides = array<i32>} : memref<8x128xf32, #tpu.memory_space<vmem>>, vector<8x128xf32>,
    %c0_13 = arith.constant 0 : index
    %c0_14 = arith.constant 0 : index
    %30 = vector.load %arg6[%c0_13, %c0_14] : memref<8x128xf32, #tpu.memory_space<vmem>>, vector<8x128xf32>
    %31 = arith.mulf %23, %4 : vector<8x256xf32>
    %32 = vector.extract_strided_slice %31 {offsets = [0, 0], sizes = [8, 128], strides = [1, 1]} : vector<8x256xf32> to vector<8x128xf32>
    %33 = vector.extract_strided_slice %31 {offsets = [0, 128], sizes = [8, 128], strides = [1, 1]} : vector<8x256xf32> to vector<8x128xf32>
    %34 = arith.addf %32, %33 : vector<8x128xf32>
    %35 = arith.addf %30, %34 : vector<8x128xf32>
    %c0_15 = arith.constant 0 : index
    %c0_16 = arith.constant 0 : index
    %36 = vector.load %arg6[%c0_15, %c0_16] : memref<8x128xf32, #tpu.memory_space<vmem>>, vector<8x128xf32>
    tpu.vector_store %arg6[%c0_15, %c0_16], %35 {strides = array<i32>} : memref<8x128xf32, #tpu.memory_space<vmem>>, vector<8x128xf32>,
    %c0_17 = arith.constant 0 : index
    %c0_18 = arith.constant 0 : index
    %37 = vector.load %arg7[%c0_17, %c0_18] : memref<8x128xf32, #tpu.memory_space<vmem>>, vector<8x128xf32>
    %38 = arith.addf %23, %4 : vector<8x256xf32>
    %39 = vector.extract_strided_slice %38 {offsets = [0, 0], sizes = [8, 128], strides = [1, 1]} : vector<8x256xf32> to vector<8x128xf32>
    %40 = vector.extract_strided_slice %38 {offsets = [0, 128], sizes = [8, 128], strides = [1, 1]} : vector<8x256xf32> to vector<8x128xf32>
    %41 = arith.addf %39, %40 : vector<8x128xf32>
    %42 = arith.addf %37, %41 : vector<8x128xf32>
    %c0_19 = arith.constant 0 : index
    %c0_20 = arith.constant 0 : index
    %43 = vector.load %arg7[%c0_19, %c0_20] : memref<8x128xf32, #tpu.memory_space<vmem>>, vector<8x128xf32>
    tpu.vector_store %arg7[%c0_19, %c0_20], %42 {strides = array<i32>} : memref<8x128xf32, #tpu.memory_space<vmem>>, vector<8x128xf32>,
    %c0_i32_21 = arith.constant 0 : i32
    %44 = arith.cmpi eq, %arg1, %c0_i32_21 : i32
    %45 = arith.extui %44 : i1 to i32
    %c0_i32_22 = arith.constant 0 : i32
    %46 = arith.cmpi ne, %45, %c0_i32_22 : i32
    scf.if %46 {
      %c0_23 = arith.constant 0 : index
      %c0_24 = arith.constant 0 : index
      %47 = vector.load %arg5[%c0_23, %c0_24] : memref<8x128xf32, #tpu.memory_space<vmem>>, vector<8x128xf32>
      %48 = vector.shape_cast %47 : vector<8x128xf32> to vector<1x8x128xf32>
      %cst_25 = arith.constant dense<0.000000e+00> : vector<1xf32>
      %49 = vector.multi_reduction <add>, %48, %cst_25 [1, 2] : vector<1x8x128xf32> to vector<1xf32>
      %50 = vector.shape_cast %49 : vector<1xf32> to vector<1x1x1xf32>
      %51 = vector.extract %50[0, 0, 0] : f32 from vector<1x1x1xf32>
      %c0_26 = arith.constant 0 : index
      %c0_27 = arith.constant 0 : index
      %52 = vector.load %arg6[%c0_26, %c0_27] : memref<8x128xf32, #tpu.memory_space<vmem>>, vector<8x128xf32>
      %cst_28 = arith.constant dense<0.000000e+00> : vector<8xf32>
      %53 = vector.multi_reduction <add>, %52, %cst_28 [1] : vector<8x128xf32> to vector<8xf32>
      %54 = vector.shape_cast %53 : vector<8xf32> to vector<8x1xf32>
      %c0_29 = arith.constant 0 : index
      %c0_30 = arith.constant 0 : index
      %55 = vector.load %arg7[%c0_29, %c0_30] : memref<8x128xf32, #tpu.memory_space<vmem>>, vector<8x128xf32>
      %cst_31 = arith.constant dense<0.000000e+00> : vector<8xf32>
      %56 = vector.multi_reduction <add>, %55, %cst_31 [1] : vector<8x128xf32> to vector<8xf32>
      %57 = vector.shape_cast %56 : vector<8xf32> to vector<8x1xf32>
      %cst_32 = arith.constant 2.000000e+00 : f32
      %58 = vector.broadcast %cst_32 : f32 to vector<8x1xf32>
      %59 = arith.mulf %58, %54 : vector<8x1xf32>
      %cst_33 = arith.constant 9.99999974E-6 : f32
      %60 = vector.broadcast %cst_33 : f32 to vector<8x1xf32>
      %61 = arith.addf %59, %60 : vector<8x1xf32>
      %cst_34 = arith.constant 9.99999974E-6 : f32
      %62 = vector.broadcast %cst_34 : f32 to vector<8x1xf32>
      %63 = arith.addf %57, %62 : vector<8x1xf32>
      %64 = arith.divf %61, %63 : vector<8x1xf32>
      %cst_35 = arith.constant 1.000000e+00 : f32
      %65 = vector.broadcast %cst_35 : f32 to vector<8x1xf32>
      %66 = arith.subf %65, %64 : vector<8x1xf32>
      %67 = vector.shape_cast %66 : vector<8x1xf32> to vector<1x8x1xf32>
      %cst_36 = arith.constant dense<0.000000e+00> : vector<1xf32>
      %68 = vector.multi_reduction <add>, %67, %cst_36 [1, 2] : vector<1x8x1xf32> to vector<1xf32>
      %69 = vector.shape_cast %68 : vector<1xf32> to vector<1x1x1xf32>
      %70 = vector.extract %69[0, 0, 0] : f32 from vector<1x1x1xf32>
      %71 = tpu.iota {dimensions = array<i32: 2>} : vector<1x1x128xi32>
      %c0_i32_37 = arith.constant 0 : i32
      %72 = vector.broadcast %c0_i32_37 : i32 to vector<1x1x128xi32>
      %73 = arith.cmpi eq, %71, %72 : vector<1x1x128xi32>
      %c1_i32 = arith.constant 1 : i32
      %74 = vector.broadcast %c1_i32 : i32 to vector<1x1x128xi32>
      %75 = arith.cmpi eq, %71, %74 : vector<1x1x128xi32>
      %cst_38 = arith.constant 0.000000e+00 : f32
      %76 = vector.broadcast %70 : f32 to vector<1x1x128xf32>
      %77 = vector.broadcast %cst_38 : f32 to vector<1x1x128xf32>
      %78 = arith.select %75, %76, %77 : vector<1x1x128xi1>, vector<1x1x128xf32>
      %79 = vector.broadcast %51 : f32 to vector<1x1x128xf32>
      %80 = arith.select %73, %79, %78 : vector<1x1x128xi1>, vector<1x1x128xf32>
      %c0_39 = arith.constant 0 : index
      %c0_40 = arith.constant 0 : index
      %c0_41 = arith.constant 0 : index
      %81 = vector.load %arg4[%c0_39, %c0_40, %c0_41] : memref<1x1x128xf32, #tpu.memory_space<vmem>>, vector<1x1x128xf32>
      tpu.vector_store %arg4[%c0_39, %c0_40, %c0_41], %80 {strides = array<i32>} : memref<1x1x128xf32, #tpu.memory_space<vmem>>, vector<1x1x128xf32>,
    } else {
    }
    return
  }
  func.func @transform_0(%arg0: i32, %arg1: i32) -> (i32, i32) {
    %c0_i32 = arith.constant 0 : i32
    return %arg0, %arg1 : i32, i32
  }
  func.func @transform_1(%arg0: i32, %arg1: i32) -> (i32, i32) {
    %c0_i32 = arith.constant 0 : i32
    return %arg0, %arg1 : i32, i32
  }
  func.func @transform_2(%arg0: i32, %arg1: i32) -> (i32, i32, i32) {
    %c0_i32 = arith.constant 0 : i32
    %c0_i32_0 = arith.constant 0 : i32
    %c0_i32_1 = arith.constant 0 : i32
    return %arg0, %c0_i32, %c0_i32_0 : i32, i32, i32
  }
}

</mosaic_0001>

<bundles_post_ra>
// kernel: tpu_custom_call.1
= control target key start
LH: loop header
LB: loop body
LE: loop exit
PB: predicated region body
PF: predicated region fallthrough
CT: control target
= control target key end

     0   :  { %7 = vsyncpa [#allocation6], 0  ;;  %s317_s0 = inlined_call_operand.hbm [shape: f32[8,256], index: 0, kind: input, shape index: {}]   ;;  %s318_s1 = inlined_call_operand.hbm [shape: f32[8,256], index: 1, kind: input, shape index: {}]   ;;  %s319_s2 = inlined_call_operand.hbm [shape: f32[1,1,128], index: 2, kind: output, shape index: {}]  }
   0x1   :  { %8 = vsyncpa [#allocation9], 0 }
   0x2   :  { %9 = vsyncpa [#allocation7], 0  ;;  %s263_s9 = smov [#allocation5]   ;;  %s264_s11 = smov [#allocation8]  }
   0x3   :  { %s16_s10 = sshll.u32 %s263_s9, 4  ;;  %s26_s12 = sshll.u32 %s264_s11, 4  ;;  %s17_s10 = int_to_ptr.vmem [resolvable:$true] %s16_s10  ;;  %s27_s12 = int_to_ptr.vmem [resolvable:$true] %s26_s12 }
   0x4   :  { %s191_s15 = scalar_lea.hbm %s317_s0, 256 }
   0x5   :  { %p192_p0 = scmp.ne.s32.totalorder %s317_s0, %s191_s15  ;;  %p195_p1 = scmp.lt.u32.totalorder %s191_s15, %s317_s0 }
   0x7   :  { %p197_p2 = pnand %p195_p1, %p192_p0 }
   0x9   :  { %200 = shalt.err (!%p197_p2)
}
   0xa   :  { %s201_s20 = scalar_lea.vmem %s17_s10, 256  ;;  %p206_p4 = scmp.lt.s32.totalorder %s17_s10, %s17_s10 }
   0xb   :  { %p202_p3 = scmp.ne.s32.totalorder %s17_s10, %s201_s20  ;;  %p207_p5 = scmp.lt.s32.totalorder %s201_s20, %s201_s20 }
   0xd   :  { %p208_p6 = por %p207_p5, %p206_p4 }
   0xf   :  { %p209_p7 = pnand %p208_p6, %p202_p3 }
  0x11   :  { %212 = shalt.err (!%p209_p7)
}
  0x12   :  { %19 = dma.hbm_to_vmem [thread:$0]  %s317_s0, 256, %s17_s10, [#allocation6]  }
  0x13   :  { %s213_s25 = scalar_lea.hbm %s318_s1, 256 }
  0x14   :  { %p214_p8 = scmp.ne.s32.totalorder %s318_s1, %s213_s25  ;;  %p217_p9 = scmp.lt.u32.totalorder %s213_s25, %s318_s1 }
  0x16   :  { %p219_p10 = pnand %p217_p9, %p214_p8 }
  0x18   :  { %222 = shalt.err (!%p219_p10)
}
  0x19   :  { %s223_s30 = scalar_lea.vmem %s27_s12, 256  ;;  %p228_p12 = scmp.lt.s32.totalorder %s27_s12, %s27_s12 }
  0x1a   :  { %p224_p11 = scmp.ne.s32.totalorder %s27_s12, %s223_s30  ;;  %p229_p13 = scmp.lt.s32.totalorder %s223_s30, %s223_s30 }
  0x1c   :  { %p230_p0 = por %p229_p13, %p228_p12 }
  0x1e   :  { %p231_p1 = pnand %p230_p0, %p224_p11 }
  0x20   :  { %234 = shalt.err (!%p231_p1)
}
  0x21   :  { %29 = dma.hbm_to_vmem [thread:$0]  %s318_s1, 256, %s27_s12, [#allocation9]  }
  0x22   :  { %257 = dma.done.wait [#allocation6], 256  }
  0x23   :  { %258 = vsyncadd [#allocation6], 4294967040 }
  0x24   :  { %259 = dma.done.wait [#allocation9], 256  }
  0x25   :  { %260 = vsyncadd [#allocation9], 4294967040  ;;  %v43_v0 = vld [vmem:[#allocation5] sm:$0xff]  ;;  %v44_v1 = vld [vmem:[#allocation5 + $0x8] sm:$0xff]  ;;  %vm134_vm4 = vcmask 7168   ;;  %s265_s4 = smov [#allocation10]  }
  0x26   :  { %v47_v2 = vand.u32 2147483647, %v43_v0  ;;  %v48_v3 = vand.u32 2147483647, %v44_v1  ;;  %vm87_vm0 = vcmp.ge.f32.partialorder %v43_v0, 0.0  ;;  %v45_v14 = vld [vmem:[#allocation8] sm:$0xff] }
  0x27   :  { %vm88_vm1 = vcmp.ge.f32.partialorder %v44_v1, 0.0  ;;  %v46_v16 = vld [vmem:[#allocation8 + $0x8] sm:$0xff]  ;;  %v55_v31 = vmax.f32 %v43_v0, 0.0  ;;  %v56_v32 = vmax.f32 %v44_v1, 0.0  ;;  %v57_v33 = vmul.f32 %v45_v14, %v43_v0  ;;  %s160_s5 = sshll.u32 %s265_s4, 4  ;;  %s161_s5 = int_to_ptr.vmem [resolvable:$true] %s160_s5 }
  0x28   :  { %v49_v4 = vsub.f32 0.0, %v47_v2  ;;  %v50_v5 = vsub.f32 0.0, %v48_v3  ;;  %v58_v34 = vmul.f32 %v46_v16, %v44_v1  ;;  %s235_s7 = scalar_lea.vmem %s161_s5, 16  ;;  %s239_s8 = scalar_lea.vmem %s161_s5, 32 }
  0x29   :  { %v59_v40 = vsub.f32 %v55_v31, %v57_v33  ;;  %p236_p2 = scmp.ne.s32.totalorder %s161_s5, %s235_s7  ;;  %p240_p3 = scmp.lt.s32.totalorder %s161_s5, %s161_s5 }
  0x2a   :  { %v51_v6 = vmul.f32 1.442695, %v49_v4  ;;  %v53_v7 = vmul.f32 1.442695, %v50_v5  ;;  %v60_v41 = vsub.f32 %v56_v32, %v58_v34  ;;  %p241_p4 = scmp.lt.s32.totalorder %s239_s8, %s235_s7 }
  0x2c   :  { %177 = vpow2.f32 %v51_v6  ;;  %p242_p5 = por %p241_p4, %p240_p3 }
  0x2d   :  { %179 = vpow2.f32 %v53_v7 }
  0x2e   :  { %p243_p6 = pnand %p242_p5, %p236_p2 }
  0x36   :  { %v178_v8 = vpop.eup %177 }
  0x37   :  { %v180_v9 = vpop.eup %179  ;;  %v61_v10 = vadd.f32 1.0, %v178_v8  ;;  %v64_v26 = vmul.f32 -0.5, %v178_v8  ;;  %v67_v38 = vand.u32 2147483647, %v178_v8 }
  0x38   :  { %v70_v11 = vadd.f32 1.0, %v180_v9  ;;  %v73_v27 = vmul.f32 -0.5, %v180_v9  ;;  %v76_v43 = vand.u32 2147483647, %v180_v9 }
  0x39   :  { %181 = vrcp.f32 %v61_v10  ;;  %v65_v28 = vadd.f32 1.0, %v64_v26  ;;  %vm68_vm2 = vcmp.lt.f32.partialorder %v67_v38, 0.0004427343 }
  0x3a   :  { %183 = vrcp.f32 %v70_v11  ;;  %v74_v29 = vadd.f32 1.0, %v73_v27  ;;  %vm77_vm3 = vcmp.lt.f32.partialorder %v76_v43, 0.0004427343 }
  0x3b   :  { %185 = vlog2.f32 %v61_v10  ;;  %v66_v37 = vmul.f32 %v178_v8, %v65_v28  ;;  %v145_v8 = vlaneseq }
  0x3c   :  { %187 = vlog2.f32 %v70_v11  ;;  %v75_v39 = vmul.f32 %v180_v9, %v74_v29 }
  0x3d   :  { %v146_v9 = vand.u32 127, %v145_v8 }
  0x3f   :  { %vm148_vm5 = vcmp.eq.s32.totalorder %v146_v9, 1  ;;  %vm147_vm6 = vcmp.eq.s32.totalorder %v146_v9, 0 }
  0x43   :  { %v182_v12 = vpop.eup %181 }
  0x44   :  { %v184_v13 = vpop.eup %183  ;;  %v89_v15 = vsub.f32 1.0, %v182_v12 }
  0x45   :  { %v90_v17 = vsub.f32 1.0, %v184_v13  ;;  %v186_v30 = vpop.eup %185 }
  0x46   :  { %v91_v18 = vsel %vm87_vm0, %v182_v12, %v89_v15  ;;  %v188_v35 = vpop.eup %187  ;;  %v63_v36 = vmul.f32 0.6931472, %v186_v30 }
  0x47   :  { %v92_v19 = vsel %vm88_vm1, %v184_v13, %v90_v17  ;;  %v104_v20 = vadd.f32 %v91_v18, %v45_v14  ;;  %v98_v22 = vmul.f32 %v91_v18, %v45_v14  ;;  %v72_v42 = vmul.f32 0.6931472, %v188_v35 }
  0x48   :  { %v105_v21 = vadd.f32 %v92_v19, %v46_v16  ;;  %v99_v23 = vmul.f32 %v92_v19, %v46_v16  ;;  %v69_v44 = vsel %vm68_vm2, %v66_v37, %v63_v36 }
  0x49   :  { %v78_v45 = vsel %vm77_vm3, %v75_v39, %v72_v42  ;;  %v79_v46 = vadd.f32 %v69_v44, %v59_v40 }
  0x4a   :  { %v106_v24 = vadd.f32 %v105_v21, %v104_v20  ;;  %v100_v25 = vadd.f32 %v99_v23, %v98_v22  ;;  %v80_v47 = vadd.f32 %v78_v45, %v60_v41 }
  0x4c   :  { %126 = vadd.xlane.f32.xlu0 %v106_v24  ;;  %v94_v48 = vadd.f32 %v80_v47, %v79_v46 }
  0x4e   :  { %113 = vadd.xlane.f32.xlu1 %v94_v48 }
  0x50   :  { %123 = vadd.xlane.f32.xlu0 %v100_v25 }
  0xd9   :  { %v127_v49 = vpop.xlane.xlu0 %126 }
  0xda   :  { %v130_v50 = vadd.f32 1e-05, %v127_v49 }
  0xdb   :  { %v114_v58 = vpop.xlane.xlu1 %113 }
  0xdc   :  { %189 = vrcp.f32 %v130_v50  ;;  %v115_v59 = vrot.slane %v114_v58, 4 }
  0xdd   :  { %v124_v51 = vpop.xlane.xlu0 %123 }
  0xde   :  { %v128_v52 = vmul.f32 2.0, %v124_v51  ;;  %v116_v60 = vadd.f32 %v115_v59, %v114_v58 }
  0xe0   :  { %v129_v53 = vadd.f32 1e-05, %v128_v52  ;;  %v117_v61 = vrot.slane %v116_v60, 2 }
  0xe2   :  { %v118_v62 = vadd.f32 %v117_v61, %v116_v60 }
  0xe4   :  { %v119_v63 = vrot.slane %v118_v62, 1 }
  0xe6   :  { %v190_v54 = vpop.eup %189  ;;  %v120_v0 = vadd.f32 %v119_v63, %v118_v62 }
  0xe7   :  { %v132_v55 = vmul.f32 %v190_v54, %v129_v53 }
  0xe8   :  { %170 = vpush %v120_v0 }
  0xe9   :  { %v133_v56 = vsub.f32 1.0, %v132_v55 }
  0xeb   :  { %v135_v57 = vsel %vm134_vm4, %v133_v56, 0.0 }
  0xec   :  { %136 = vadd.xlane.f32.xlu1 %v135_v57 }
 0x119   :  { %s171_s1 = spop %170 }
 0x11a   :  { %v151_v11 = vstv %s171_s1 }
 0x179   :  { %v137_v1 = vpop.xlane.xlu1 %136 }
 0x17a   :  { %v138_v2 = vrot.slane %v137_v1, 4 }
 0x17c   :  { %v139_v3 = vadd.f32 %v138_v2, %v137_v1 }
 0x17e   :  { %v140_v4 = vrot.slane %v139_v3, 2 }
 0x180   :  { %v141_v5 = vadd.f32 %v140_v4, %v139_v3 }
 0x182   :  { %v142_v6 = vrot.slane %v141_v5, 1 }
 0x184   :  { %v143_v7 = vadd.f32 %v142_v6, %v141_v5 }
 0x186   :  { %172 = vpush %v143_v7 }
 0x1b7   :  { %s173_s6 = spop %172 }
 0x1b8   :  { %v149_v10 = vstv %s173_s6 }
 0x1b9   :  { %v150_v12 = vsel %vm148_vm5, %v149_v10, 0.0 }
 0x1ba   :  { %v152_v13 = vsel %vm147_vm6, %v151_v11, %v150_v12 }
 0x1bb   :  { %153 = vst [vmem:[#allocation10] sm:$0x1] %v152_v13 }
 0x1bc   :  { %246 = shalt.err (!%p243_p6)
}
 0x1bd   :  { %s247_s11 = scalar_lea.hbm %s319_s2, 16 }
 0x1be   :  { %p248_p7 = scmp.ne.s32.totalorder %s319_s2, %s247_s11  ;;  %p251_p8 = scmp.lt.u32.totalorder %s247_s11, %s319_s2 }
 0x1c0   :  { %p253_p9 = pnand %p251_p8, %p248_p7 }
 0x1c2   :  { %256 = shalt.err (!%p253_p9)
}
 0x1c3   :  { %163 = dma.vmem_to_hbm [thread:$0]  %s161_s5, 16, %s319_s2, [#allocation7]  }
 0x1c4   :  { %261 = dma.done.wait [#allocation7], 16  }
 0x1c5   :  { %262 = vsyncadd [#allocation7], 4294967280 }
 0x1c6   :  { %167 = vsyncpa [#allocation6], 1 }
 0x1c7   :  { %168 = vsyncpa [#allocation9], 1 }
 0x1c8   :  { %169 = vsyncpa [#allocation7], 1 }

</bundles_post_ra>
